<compile_context>
chip_gen: v6e
topology: v6e:2x2x1
jax: 0.10.0
libtpu: 0.0.40
codegen_flags: <defaults>
</compile_context>

<pallas_src>
import functools

import jax
import jax.numpy as jnp
from jax.experimental import pallas as pl
from jax.experimental.pallas import tpu as pltpu

LANE = 128  # every feature dim is padded to the TPU lane width in the weight pack


def _round_up(x, m):
    return (x + m - 1) // m * m


def _cdiv(a, b):
    return (a + b - 1) // b


# ------------------------------------------------------------------ kernel ---
def daml_kernel(x_ref, w_ref, b_ref, out_ref, *, d_in):
    """Fused encoder+decoder MLP for one tile of rows.

    x_ref:   (tm, d_in)     f32 rows (flattened batch*time), cast to bf16 here
    w_ref:   (3, 128, 128)  bf16 packed weights [we1, we2@wd1, wd2] (zero-padded)
    b_ref:   (3, 128)       f32  packed biases  [be1, be2@wd1+bd1, bd2]
    out_ref: (tm, 128)      bf16 (only the first d_in lanes are meaningful)
    """
    x = x_ref[...].astype(jnp.bfloat16)           # in-kernel cast, no host pass
    b = b_ref[...]                                # tiny f32 bias table

    # ---- encoder layer 1: Linear -> ReLU   (K = d_in, static sublane slice)
    h = jnp.dot(x, w_ref[0, :d_in, :],
                preferred_element_type=jnp.float32) + b[0:1, :]
    h = jnp.maximum(h, 0.0).astype(jnp.bfloat16)

    # ---- fused encoder-2 / decoder-1 (no nonlinearity in between): Linear -> ReLU
    g = jnp.dot(h, w_ref[1], preferred_element_type=jnp.float32) + b[1:2, :]
    g = jnp.maximum(g, 0.0).astype(jnp.bfloat16)

    # ---- decoder layer 2: Linear
    y = jnp.dot(g, w_ref[2], preferred_element_type=jnp.float32) + b[2:3, :]

    out_ref[...] = y.astype(out_ref.dtype)        # lane-dense 128-wide bf16 store


# ----------------------------------------------------------------- wrapper ---
def daml_forward(x, w_pack, b_pack, *, tm_max=4096):
    """x: (B, S, D_in) float32 -> (B, S, D_in) float32."""
    B, S, d_in = x.shape
    M = B * S
    x2d = x.reshape(M, d_in)        # contiguous reshape, no data movement

    # Equalized row tiles: at most tm_max rows/tile, at least 2 grid steps
    # (so both v7x TensorCores are busy) whenever M allows; tail waste <= 7 rows.
    n_tiles = max(_cdiv(M, tm_max), 2 if M > 8 else 1)
    tm = _round_up(_cdiv(M, n_tiles), 8)
    grid = _cdiv(M, tm)             # partial last tile: OOB reads are per-row
                                    # garbage, OOB output rows are not written

    flops = 2 * M * (d_in + 2 * LANE) * LANE
    bytes_accessed = (M * d_in * 4          # x in (f32)
                      + M * LANE * 2        # out (bf16)
                      + w_pack.size * 2     # weights (bf16)
                      + b_pack.size * 4)    # biases (f32)

    out2d = pl.pallas_call(
        functools.partial(daml_kernel, d_in=d_in),
        out_shape=jax.ShapeDtypeStruct((M, LANE), jnp.bfloat16),
        grid_spec=pltpu.PrefetchScalarGridSpec(
            num_scalar_prefetch=0,
            grid=(grid,),
            in_specs=[
                pl.BlockSpec((tm, d_in), lambda i: (i, 0)),          # x, streamed
                pl.BlockSpec((3, LANE, LANE), lambda i: (0, 0, 0)),  # weights, resident
                pl.BlockSpec((3, LANE), lambda i: (0, 0)),           # biases, resident
            ],
            out_specs=pl.BlockSpec((tm, LANE), lambda i: (i, 0)),
        ),
        compiler_params=pltpu.CompilerParams(
            dimension_semantics=("parallel",)),
        cost_estimate=pl.CostEstimate(
            flops=flops, transcendentals=0, bytes_accessed=bytes_accessed),
    )(x2d, w_pack, b_pack)

    # Only the first d_in lanes are meaningful; caller expects f32.
    return out2d[:, :d_in].astype(jnp.float32).reshape(B, S, d_in)


# ------------------------------------------------------------------ params ---
def init_params(key, d_in, hidden, latent):
    """Deterministic PyTorch-Linear-style init (uniform +/- 1/sqrt(fan_in))."""
    ks = jax.random.split(key, 8)

    def linear(kw, kb, fan_in, fan_out):
        bound = 1.0 / jnp.sqrt(fan_in)
        w = jax.random.uniform(kw, (fan_in, fan_out), jnp.float32, -bound, bound)
        b = jax.random.uniform(kb, (1, fan_out), jnp.float32, -bound, bound)
        return w, b

    we1, be1 = linear(ks[0], ks[1], d_in,   hidden)
    we2, be2 = linear(ks[2], ks[3], hidden, latent)
    wd1, bd1 = linear(ks[4], ks[5], latent, hidden)
    wd2, bd2 = linear(ks[6], ks[7], hidden, d_in)
    return (we1, be1, we2, be2, wd1, bd1, wd2, bd2)


def pack_params(params):
    """Fuse the middle linear pair and zero-pad into (3,128,128)/(3,128) packs."""
    we1, be1, we2, be2, wd1, bd1, wd2, bd2 = params
    d_in, hidden = we1.shape
    latent = we2.shape[1]
    assert max(d_in, hidden, latent) <= LANE, (
        "pack_params assumes every feature dim fits one 128-lane tile")

    # Encoder layer-2 and decoder layer-1 have no nonlinearity between them:
    #   z @ wd1 + bd1 == h1 @ (we2 @ wd1) + (be2 @ wd1 + bd1)
    # Fused once in f32 on the host (rank-latent bottleneck preserved).
    w_mid = we2 @ wd1
    b_mid = be2 @ wd1 + bd1

    def pad_w(w):
        k, n = w.shape
        return jnp.zeros((LANE, LANE), jnp.float32).at[:k, :n].set(w)

    def pad_b(b):
        n = b.shape[-1]
        return jnp.zeros((LANE,), jnp.float32).at[:n].set(b.reshape(-1))

    w_pack = jnp.stack([pad_w(we1), pad_w(w_mid), pad_w(wd2)]).astype(jnp.bfloat16)
    b_pack = jnp.stack([pad_b(be1), pad_b(b_mid), pad_b(bd2)])
    return w_pack, b_pack


def reference_forward(x, params):
    """Pure-JAX reference mirroring the PyTorch per-timestep loop (4 unfused
    linears).  Matmul operands are cast to bf16 with f32 accumulation to match
    the kernel's MXU precision policy; the kernel additionally fuses the
    middle pair and stores bf16, so agreement is at the bf16-rounding level.
    """
    we1, be1, we2, be2, wd1, bd1, wd2, bd2 = params

    def mm(a, w):
        return jnp.dot(a.astype(jnp.bfloat16), w.astype(jnp.bfloat16),
                       preferred_element_type=jnp.float32)

    def encoder(xt):
        h = jnp.maximum(mm(xt, we1) + be1, 0.0)
        return mm(h, we2) + be2

    def decoder(zt):
        g = jnp.maximum(mm(zt, wd1) + bd1, 0.0)
        return mm(g, wd2) + bd2

    S = x.shape[1]
    enc = jnp.stack([encoder(x[:, t]) for t in range(S)], axis=1)
    dec = jnp.stack([decoder(enc[:, t]) for t in range(S)], axis=1)
    return dec


# -------------------------------------------------------------------- main ---
if __name__ == "__main__":
    B, S, D_IN, HIDDEN, LATENT = 2, 8, 32, 64, 16

    key = jax.random.PRNGKey(0)
    kx, kp = jax.random.split(key)
    x = jax.random.normal(kx, (B, S, D_IN), jnp.float32)
    params = init_params(kp, D_IN, HIDDEN, LATENT)
    w_pack, b_pack = pack_params(params)

    out = daml_forward(x, w_pack, b_pack)
    out = jax.block_until_ready(out)

    ref = reference_forward(x, params)
    assert out.shape == (B, S, D_IN)
    # bf16 output store + fused-vs-unfused middle layer => bf16-level tolerance.
    assert jnp.allclose(out, ref, atol=2e-2, rtol=2e-2), "mismatch vs JAX reference"

    print("KERNEL_OK")
</pallas_src>

<mosaic_0001>
module attributes {stable_mosaic.version = 11 : i64} {
  func.func @daml_kernel(%arg0: i32, %arg1: memref<8x32xf32, #tpu.memory_space<vmem>>, %arg2: memref<3x128x128xbf16, #tpu.memory_space<vmem>>, %arg3: memref<3x128xf32, #tpu.memory_space<vmem>>, %arg4: memref<8x128xbf16, #tpu.memory_space<vmem>>) attributes {dimension_semantics = [#tpu.dimension_semantics<parallel>], iteration_bounds = array<i64: 2>, scalar_prefetch = 0 : i64, scratch_operands = 0 : i64, tpu.core_type = #tpu.core_type<tc>, window_params = [{transform_indices = @transform_0, window_bounds = array<i64: 8, 32>}, {pipeline_mode = #tpu.pipeline_mode<synchronous>, transform_indices = @transform_1, window_bounds = array<i64: 3, 128, 128>}, {pipeline_mode = #tpu.pipeline_mode<synchronous>, transform_indices = @transform_2, window_bounds = array<i64: 3, 128>}, {transform_indices = @transform_3, window_bounds = array<i64: 8, 128>}]} {
    %c0 = arith.constant 0 : index
    %c0_0 = arith.constant 0 : index
    %0 = vector.load %arg1[%c0, %c0_0] : memref<8x32xf32, #tpu.memory_space<vmem>>, vector<8x32xf32>
    %1 = arith.truncf %0 : vector<8x32xf32> to vector<8x32xbf16>
    %c0_1 = arith.constant 0 : index
    %c0_2 = arith.constant 0 : index
    %2 = vector.load %arg3[%c0_1, %c0_2] : memref<3x128xf32, #tpu.memory_space<vmem>>, vector<3x128xf32>
    %c0_3 = arith.constant 0 : index
    %c0_4 = arith.constant 0 : index
    %c0_5 = arith.constant 0 : index
    %3 = vector.load %arg2[%c0_3, %c0_4, %c0_5] : memref<3x128x128xbf16, #tpu.memory_space<vmem>>, vector<1x32x128xbf16>
    %4 = vector.shape_cast %3 : vector<1x32x128xbf16> to vector<32x128xbf16>
    %cst = arith.constant dense<0.000000e+00> : vector<8x128xf32>
    %5 = tpu.matmul %1, %4, %cst {dimension_numbers = #tpu.dot_dimension_numbers<[1], [0], [0], [1], [0, 0, 1, 1], [], []>} : vector<8x32xbf16>, vector<32x128xbf16>, vector<8x128xf32> -> vector<8x128xf32>
    %6 = vector.extract_strided_slice %2 {offsets = [0, 0], sizes = [1, 128], strides = [1, 1]} : vector<3x128xf32> to vector<1x128xf32>
    %7 = vector.broadcast %6 : vector<1x128xf32> to vector<8x128xf32>
    %8 = arith.addf %5, %7 : vector<8x128xf32>
    %cst_6 = arith.constant 0.000000e+00 : f32
    %9 = vector.broadcast %cst_6 : f32 to vector<8x128xf32>
    %10 = arith.maximumf %8, %9 : vector<8x128xf32>
    %11 = arith.truncf %10 : vector<8x128xf32> to vector<8x128xbf16>
    %c1 = arith.constant 1 : index
    %c0_7 = arith.constant 0 : index
    %c0_8 = arith.constant 0 : index
    %12 = vector.load %arg2[%c1, %c0_7, %c0_8] : memref<3x128x128xbf16, #tpu.memory_space<vmem>>, vector<1x128x128xbf16>
    %13 = vector.shape_cast %12 : vector<1x128x128xbf16> to vector<128x128xbf16>
    %cst_9 = arith.constant dense<0.000000e+00> : vector<8x128xf32>
    %14 = tpu.matmul %11, %13, %cst_9 {dimension_numbers = #tpu.dot_dimension_numbers<[1], [0], [0], [1], [0, 0, 1, 1], [], []>} : vector<8x128xbf16>, vector<128x128xbf16>, vector<8x128xf32> -> vector<8x128xf32>
    %15 = vector.extract_strided_slice %2 {offsets = [1, 0], sizes = [1, 128], strides = [1, 1]} : vector<3x128xf32> to vector<1x128xf32>
    %16 = vector.broadcast %15 : vector<1x128xf32> to vector<8x128xf32>
    %17 = arith.addf %14, %16 : vector<8x128xf32>
    %cst_10 = arith.constant 0.000000e+00 : f32
    %18 = vector.broadcast %cst_10 : f32 to vector<8x128xf32>
    %19 = arith.maximumf %17, %18 : vector<8x128xf32>
    %20 = arith.truncf %19 : vector<8x128xf32> to vector<8x128xbf16>
    %c2 = arith.constant 2 : index
    %c0_11 = arith.constant 0 : index
    %c0_12 = arith.constant 0 : index
    %21 = vector.load %arg2[%c2, %c0_11, %c0_12] : memref<3x128x128xbf16, #tpu.memory_space<vmem>>, vector<1x128x128xbf16>
    %22 = vector.shape_cast %21 : vector<1x128x128xbf16> to vector<128x128xbf16>
    %cst_13 = arith.constant dense<0.000000e+00> : vector<8x128xf32>
    %23 = tpu.matmul %20, %22, %cst_13 {dimension_numbers = #tpu.dot_dimension_numbers<[1], [0], [0], [1], [0, 0, 1, 1], [], []>} : vector<8x128xbf16>, vector<128x128xbf16>, vector<8x128xf32> -> vector<8x128xf32>
    %24 = vector.extract_strided_slice %2 {offsets = [2, 0], sizes = [1, 128], strides = [1, 1]} : vector<3x128xf32> to vector<1x128xf32>
    %25 = vector.broadcast %24 : vector<1x128xf32> to vector<8x128xf32>
    %26 = arith.addf %23, %25 : vector<8x128xf32>
    %27 = arith.truncf %26 : vector<8x128xf32> to vector<8x128xbf16>
    %c0_14 = arith.constant 0 : index
    %c0_15 = arith.constant 0 : index
    %28 = vector.load %arg4[%c0_14, %c0_15] : memref<8x128xbf16, #tpu.memory_space<vmem>>, vector<8x128xbf16>
    tpu.vector_store %arg4[%c0_14, %c0_15], %27 {strides = array<i32>} : memref<8x128xbf16, #tpu.memory_space<vmem>>, vector<8x128xbf16>,
    return
  }
  func.func @transform_0(%arg0: i32) -> (i32, i32) {
    %c0_i32 = arith.constant 0 : i32
    %c0_i32_0 = arith.constant 0 : i32
    return %arg0, %c0_i32 : i32, i32
  }
  func.func @transform_1(%arg0: i32) -> (i32, i32, i32) {
    %c0_i32 = arith.constant 0 : i32
    %c0_i32_0 = arith.constant 0 : i32
    %c0_i32_1 = arith.constant 0 : i32
    %c0_i32_2 = arith.constant 0 : i32
    return %c0_i32, %c0_i32_0, %c0_i32_1 : i32, i32, i32
  }
  func.func @transform_2(%arg0: i32) -> (i32, i32) {
    %c0_i32 = arith.constant 0 : i32
    %c0_i32_0 = arith.constant 0 : i32
    %c0_i32_1 = arith.constant 0 : i32
    return %c0_i32, %c0_i32_0 : i32, i32
  }
  func.func @transform_3(%arg0: i32) -> (i32, i32) {
    %c0_i32 = arith.constant 0 : i32
    %c0_i32_0 = arith.constant 0 : i32
    return %arg0, %c0_i32 : i32, i32
  }
}

</mosaic_0001>

<bundles_post_ra>
// kernel: tpu_custom_call.1
= control target key start
LH: loop header
LB: loop body
LE: loop exit
PB: predicated region body
PF: predicated region fallthrough
CT: control target
= control target key end

     0   :  { %8 = vsyncpa [#allocation3], 0  ;;  %s1181_s0 = inlined_call_operand.hbm [shape: f32[16,32], index: 0, kind: input, shape index: {}]   ;;  %s1182_s1 = inlined_call_operand.hbm [shape: bf16[3,128,128], index: 1, kind: input, shape index: {}]   ;;  %s1183_s2 = inlined_call_operand.hbm [shape: f32[3,128], index: 2, kind: input, shape index: {}]   ;;  %s1184_s3 = inlined_call_operand.hbm [shape: bf16[16,128], index: 3, kind: output, shape index: {}]  }
   0x1   :  { %10 = vsyncpa [#allocation3 + $0x1], 0 }
   0x2   :  { %11 = vsyncpa [#allocation6], 0 }
   0x3   :  { %12 = vsyncpa [#allocation4], 0 }
   0x4   :  { %14 = vsyncpa [#allocation4 + $0x1], 0  ;;  %s979_s12 = smov 0   ;;  %s981_s13 = smov 0  }
   0x5   :  { %s983_s14 = smov 0   ;;  %s985_s15 = smov 0  }
   0x6 LB: > { %s1000_s16 = sadd.s32 4294967295, %s949_s15   ;;  %s608_s17 = sadd.s32 4294967294, %s949_s15   ;;  %s949_s15 = sphi %s985_s15, %s1206_s15   ;;  %s945_s14 = sphi %s983_s14, %s1205_s14   ;;  %s941_s13 = sphi %s981_s13, %s1204_s13   ;;  %s937_s12 = sphi %s979_s12, %s1203_s12  }
   0x7   : > { %p40_p0 = scmp.ne.s32.totalorder %s941_s13, %s937_s12  ;;  %p1185_p1 = scmp.eq.s32.totalorder %s1000_s16, 0 }
   0x8   : > { %p112_p3 = scmp.eq.s32.totalorder %s608_s17, 1  ;;  %p609_p5 = scmp.ge.s32.totalorder %s949_s15, 1 }
   0x9   : > { %p1009_p4 = por %p1185_p1, %p40_p0  ;;  %p119_p7 = scmp.lt.s32.totalorder %s949_s15, 3 }
   0xa   : > { %p1014_p6 = por %p112_p3, %p40_p0  ;;  %s951_s21 = smov [#allocation5]  }
   0xb   : > { %s1189_s18 = scalar_select %p1009_p4, 1, 0 }
   0xc   : > { %s1190_s19 = scalar_select %p1014_p6, 1, 0 }
   0xd   : > { %p1019_p8 = pnand %p609_p5, %p119_p7  ;;  %s131_s22 = sshll.u32 %s951_s21, 4  ;;  %s132_s22 = int_to_ptr.vmem [resolvable:$true] %s131_s22 }
   0xe   : > { %s952_s24 = smov [#allocation7]   ;;  %s812_s26 = scalar_lea.vmem %s132_s22, 3072 }
   0xf   : > { %s1191_s20 = scalar_select %p1019_p8, 1, 0 }
  0x10   : > { %p724_p9 = pneg %p1019_p8  ;;  %s145_s25 = sshll.u32 %s952_s24, 4  ;;  %s146_s25 = int_to_ptr.vmem [resolvable:$true] %s145_s25 }
  0x11   : > { %p813_p13 = scmp.ne.s32.totalorder %s132_s22, %s812_s26  ;;  %p820_p5 = scmp.lt.s32.totalorder %s132_s22, %s132_s22 }
  0x12   : > { %p1028_p11 = pnand %p724_p9, %p1185_p1  ;;  %p821_p7 = scmp.lt.s32.totalorder %s812_s26, %s812_s26 }
  0x14   : > { %p803_p12 = pneg %p1028_p11  ;;  %p822_p10 = por %p821_p7, %p820_p5 }
  0x16   : > { %p815_p0 = pnand %p813_p13, %p803_p12 }
  0x18   : > { %p816_p3 = pneg %p815_p0 }
  0x1a   : > { %p823_p9 = pnand %p822_p10, %p816_p3 }
  0x1c   : > { %826 = shalt.err (!%p823_p9)
}
  0x1d   : > { %s953_s27 = smov 64   ;;  %s954_s28 = smov 4  }
  0x1e   : > { %727 = dma.hbm_to_vmem [thread:$0]  (!%p1028_p11), %s1182_s1, 3072, %s132_s22, [#allocation6], %s953_s27, %s953_s27, %s954_s28  }
  0x1f   : > { %s838_s4 = scalar_lea.vmem %s146_s25, 64  ;;  %p846_p2 = scmp.lt.s32.totalorder %s146_s25, %s146_s25 }
  0x20   : > { %p839_p1 = scmp.ne.s32.totalorder %s146_s25, %s838_s4  ;;  %p847_p6 = scmp.lt.s32.totalorder %s838_s4, %s838_s4 }
  0x22   : > { %p841_p13 = pnand %p839_p1, %p803_p12  ;;  %p848_p5 = por %p847_p6, %p846_p2 }
  0x24   : > { %p842_p0 = pneg %p841_p13 }
  0x26   : > { %p849_p10 = pnand %p848_p5, %p842_p0 }
  0x28   : > { %852 = shalt.err (!%p849_p10)
}
  0x29   : > { %730 = dma.hbm_to_vmem [thread:$0]  (!%p1028_p11), %s1183_s2, 64, %s146_s25, [#allocation6]  }
  0x2a   : > { %s1051_s7 = sadd.s32 1, %s949_s15   ;;  %s27_s8 = sadd.s32 1, %s945_s14 }
  0x2b   : > { %s24_s9 = ssub.s32 %s949_s15, %s1051_s7  ;;  %p34_p1 = scmp.ne.s32.totalorder %s945_s14, %s941_s13 }
  0x2c   : > { %p25_p2 = scmp.eq.s32.totalorder %s24_s9, 0  ;;  %p35_p6 = scmp.eq.s32.totalorder %s949_s15, 0 }
  0x2d   : > { %p1193_p12 = scmp.eq.s32.totalorder %s1000_s16, 1  ;;  %p741_p7 = scmp.lt.s32.totalorder %s949_s15, 2 }
  0x2e   : > { %s1067_s11 = scalar_select %p25_p2, %s945_s14, %s27_s8  }
  0x2f   : > { %p1061_p3 = por %p1193_p12, %p34_p1  ;;  %p36_p9 = por %p35_p6, %p34_p1 }
  0x30   : > { %s156_s17 = sand.u32 1, %s945_s14   ;;  %s614_s22 = sshll.u32 %s949_s15, 7 }
  0x31   : > { %s1194_s10 = scalar_select %p1061_p3, 1, 0 }
  0x32   : > { %s613_s21 = sshll.u32 %s156_s17, 3  ;;  %s1074_s25 = scalar_lea.hbm %s1181_s0, %s614_s22 }
  0x33   : > { %s160_s26 = scalar_lea.vmem [#allocation2], %s613_s21  ;;  %p1076_p11 = pnand %p741_p7, %p36_p9 }
  0x34   : > { %s167_s27 = sshll.u32 %s160_s26, 4  ;;  %s157_s29 = scalar_lea.sflag [#allocation3], %s156_s17  ;;  %s168_s27 = int_to_ptr.vmem [resolvable:$true] %s167_s27 }
  0x35   : > { %s853_s30 = scalar_lea.hbm %s1074_s25, 128  ;;  %p855_p0 = pneg %p1076_p11 }
  0x36   : > { %p854_p13 = scmp.ne.s32.totalorder %s1074_s25, %s853_s30  ;;  %s858_s6 = scalar_lea.hbm %s1181_s0, 256 }
  0x37   : > { %p859_p1 = scmp.lt.s32.totalorder %s1074_s25, %s1181_s0  ;;  %p860_p2 = scmp.lt.s32.totalorder %s858_s6, %s853_s30 }
  0x38   : > { %p856_p5 = pnand %p855_p0, %p854_p13 }
  0x39   : > { %p861_p6 = por %p860_p2, %p859_p1 }
  0x3a   : > { %p857_p10 = pneg %p856_p5 }
  0x3c   : > { %p862_p12 = pnand %p861_p6, %p857_p10 }
  0x3e   : > { %865 = shalt.err (!%p862_p12)
}
  0x3f   : > { %s866_s21 = scalar_lea.vmem %s168_s27, 128  ;;  %s955_s17 = smov [#allocation2]  }
  0x40   : > { %p867_p7 = scmp.ne.s32.totalorder %s168_s27, %s866_s21  ;;  %s871_s22 = sshll.u32 %s955_s17, 4  ;;  %s872_s22 = int_to_ptr.vmem [resolvable:$false] %s871_s22 }
  0x41   : > { %s873_s23 = scalar_lea.vmem %s872_s22, 256  ;;  %p874_p13 = scmp.lt.s32.totalorder %s168_s27, %s872_s22 }
  0x42   : > { %p869_p9 = pnand %p867_p7, %p855_p0  ;;  %p875_p5 = scmp.lt.s32.totalorder %s873_s23, %s866_s21 }
  0x44   : > { %p870_p3 = pneg %p869_p9  ;;  %p876_p4 = por %p875_p5, %p874_p13 }
  0x46   : > { %p877_p8 = pnand %p876_p4, %p870_p3 }
  0x48   : > { %880 = shalt.err (!%p877_p8)
}
  0x49   : > { %734 = dma.hbm_to_vmem [thread:$0]  (!%p1076_p11), %s1074_s25, 128, %s168_s27, %s157_s29  }
  0x4a   : > { %p1196_p10 = scmp.ne.s32.totalorder %s1191_s20, 0 }
  0x4b   : > { %s1097_s24 = sand.u32 (!%p1196_p10), 1, %s941_s13   ;;  %p1197_p0 = scmp.ne.s32.totalorder (!%p1196_p10), %s1189_s18, 0 }
  0x4c   : > { %176 = sbr.rel (%p1196_p10) target bundleno = 704 (0x2c0), region = 32  ;;  %s616_s26 = sshll.u32 (!%p1196_p10), %s1097_s24, 3 }
  0x4d   : > { %s179_s30 = scalar_lea.sflag (!%p1196_p10), [#allocation3], %s1097_s24  ;;  %s182_s4 = scalar_lea.vmem (!%p1196_p10), [#allocation2], %s616_s26 }
  0x51   : > { %924 = dma.done.wait (%p1197_p0), %s179_s30, 128  }
  0x52   : > { %926 = vsyncadd (%p1197_p0), %s179_s30, 4294967168  ;;  %p1198_p4 = scmp.eq.s32.totalorder %s1000_s16, 0 }
  0x54   : > { %928 = dma.done.wait (%p1198_p4), [#allocation6], 3136   ;;  %p1199_p8 = pmov %p1198_p4 }
  0x55   : > { %v956_v0 = vmov 0.0   ;;  %vm957_vm0 = vmmov 0   ;;  %v783_v1 = vld [vmem:[#allocation5 + $0x8] sm:$0xff]   ;;  %v784_v2 = vld [vmem:[#allocation5] sm:$0xff]   ;;  %v214_v3 = vld [vmem:[%s182_s4] sm:$0xff]  ;;  %vm237_vm1 = vcmask 261120   ;;  %v221_v19 = vlaneseq }
  0x56   : > { %930 = vsyncadd (%p1199_p8), [#allocation6], 4294964160  ;;  %664 = vmatprep.subr.bf16.mxu0 %v956_v0  ;;  %668 = vmatprep.mubr.msk.bf16.mxu0 %vm957_vm0, %v956_v0  ;;  %v785_v4 = vld [vmem:[#allocation5 + $0x78] sm:$0xff]   ;;  %v215_v5 = vpack.c.bf16 %v214_v3, %v214_v3  ;;  %v786_v6 = vld [vmem:[#allocation5 + $0x70] sm:$0xff]   ;;  %s619_s18 = sshll.u32 %s1097_s24, 2  ;;  %s640_s20 = sshll.u32 %s1000_s16, 6 }
  0x57   : > { %672 = vmatprep.subr.bf16.mxu1 %v956_v0  ;;  %688 = vmatprep.mubr.msk.bf16.mxu1 %vm957_vm0, %v956_v0  ;;  %v787_v7 = vld [vmem:[#allocation5 + $0x68] sm:$0xff]   ;;  %v788_v8 = vld [vmem:[#allocation5 + $0x60] sm:$0xff]   ;;  %v789_v9 = vld [vmem:[#allocation5 + $0x58] sm:$0xff]   ;;  %v222_v20 = vshrl.u32 %v221_v19, 7  ;;  %s212_s25 = scalar_lea.vmem [#allocation8], %s619_s18  ;;  %s1138_s5 = scalar_lea.hbm %s1184_s3, %s640_s20 }
  0x58   : > { %665 = vmatpush3.bf16.msra.mxu0 %v783_v1  ;;  %673 = vmatpush3.bf16.msra.mxu1 %v785_v4  ;;  %v790_v10 = vld [vmem:[#allocation5 + $0x50] sm:$0xff]   ;;  %v791_v11 = vld [vmem:[#allocation5 + $0x48] sm:$0xff]   ;;  %v792_v12 = vld [vmem:[#allocation5 + $0x40] sm:$0xff]   ;;  %s519_s27 = sshll.u32 %s212_s25, 4  ;;  %s506_s6 = scalar_lea.sflag [#allocation4], %s1097_s24  ;;  %s1140_s27 = int_to_ptr.vmem [resolvable:$true] %s519_s27 }
  0x59   : > { %666 = vmatprep.subr.bf16.mxu0 %v956_v0  ;;  %674 = vmatprep.subr.bf16.mxu1 %v956_v0  ;;  %v793_v13 = vld [vmem:[#allocation5 + $0xb8] sm:$0xff]   ;;  %v794_v14 = vld [vmem:[#allocation5 + $0xb0] sm:$0xff]   ;;  %v795_v15 = vld [vmem:[#allocation5 + $0xa8] sm:$0xff]   ;;  %v223_v21 = vsub.s32 0, %v222_v20  ;;  %v302_v33 = vsub.s32 1, %v222_v20  ;;  %v413_v42 = vsub.s32 2, %v222_v20 }
  0x5a   : > { %v796_v16 = vld [vmem:[#allocation5 + $0xa0] sm:$0xff]   ;;  %v797_v17 = vld [vmem:[#allocation5 + $0x98] sm:$0xff]   ;;  %v798_v18 = vld [vmem:[#allocation5 + $0x90] sm:$0xff]   ;;  %s881_s16 = scalar_lea.vmem %s1140_s27, 64  ;;  %p1200_p11 = scmp.ne.s32.totalorder %s1194_s10, 0 }
  0x5b   : > { %v216_v22 = vld [vmem:[#allocation7] sm:$0x7]  ;;  %v799_v31 = vld [vmem:[#allocation5 + $0x88] sm:$0xff]   ;;  %p882_p3 = scmp.ne.s32.totalorder %s1140_s27, %s881_s16  ;;  %s958_s8 = smov [#allocation8]  }
  0x5c   : > { %667 = vmatpush3.bf16.msra.mxu0 %v784_v2  ;;  %675 = vmatpush3.bf16.msra.mxu1 %v786_v6  ;;  %v224_v23 = vrot.slane %v216_v22, %v223_v21  ;;  %v800_v32 = vld [vmem:[#allocation5 + $0x80] sm:$0xff]   ;;  %v303_v34 = vrot.slane %v216_v22, %v302_v33  ;;  %v414_v43 = vrot.slane %v216_v22, %v413_v42  ;;  %s885_s9 = sshll.u32 %s958_s8, 4  ;;  %s886_s9 = int_to_ptr.vmem [resolvable:$false] %s885_s9 }
  0x5d   : > { %692 = vmatprep.subr.bf16.mxu0 %v956_v0  ;;  %676 = vmatprep.subr.bf16.mxu1 %v956_v0  ;;  %p883_p1 = pnand %p882_p3, %p1200_p11  ;;  %s887_s21 = scalar_lea.vmem %s886_s9, 128 }
  0x5e   : > { %p888_p6 = scmp.lt.s32.totalorder %s1140_s27, %s886_s9  ;;  %p889_p12 = scmp.lt.s32.totalorder %s887_s21, %s881_s16 }
  0x5f   : > { %669 = vmatmul.mubr.msk.bf16.vlgmr.msra.gmra.mxu0 %vm237_vm1, %v215_v5  ;;  %p884_p2 = pneg %p883_p1 }
  0x60   : > { %708 = vmatprep.mubr.msk.bf16.mxu0 %vm957_vm0, %v956_v0  ;;  %677 = vmatpush3.bf16.msra.mxu1 %v787_v7  ;;  %p890_p7 = por %p889_p12, %p888_p6 }
  0x61   : > { %678 = vmatprep.subr.bf16.mxu1 %v956_v0  ;;  %693 = vmatpush3.bf16.msra.mxu0 %v793_v13 }
  0x62   : > { %694 = vmatprep.subr.bf16.mxu0 %v956_v0  ;;  %p891_p9 = pnand %p890_p7, %p884_p2 }
  0x64   : > { %679 = vmatpush3.bf16.msra.mxu1 %v788_v8 }
  0x65   : > { %680 = vmatprep.subr.bf16.mxu1 %v956_v0  ;;  %695 = vmatpush3.bf16.msra.mxu0 %v794_v14 }
  0x66   : > { %696 = vmatprep.subr.bf16.mxu0 %v956_v0 }
  0x68   : > { %681 = vmatpush3.bf16.msra.mxu1 %v789_v9 }
  0x69   : > { %682 = vmatprep.subr.bf16.mxu1 %v956_v0  ;;  %697 = vmatpush3.bf16.msra.mxu0 %v795_v15 }
  0x6a   : > { %698 = vmatprep.subr.bf16.mxu0 %v956_v0 }
  0x6c   : > { %683 = vmatpush3.bf16.msra.mxu1 %v790_v10 }
  0x6d   : > { %684 = vmatprep.subr.bf16.mxu1 %v956_v0  ;;  %699 = vmatpush3.bf16.msra.mxu0 %v796_v16 }
  0x6e   : > { %700 = vmatprep.subr.bf16.mxu0 %v956_v0 }
  0x70   : > { %685 = vmatpush3.bf16.msra.mxu1 %v791_v11 }
  0x71   : > { %686 = vmatprep.subr.bf16.mxu1 %v956_v0  ;;  %701 = vmatpush3.bf16.msra.mxu0 %v797_v17 }
  0x72   : > { %702 = vmatprep.subr.bf16.mxu0 %v956_v0 }
  0x74   : > { %687 = vmatpush3.bf16.msra.mxu1 %v792_v12 }
  0x75   : > { %703 = vmatpush3.bf16.msra.mxu0 %v798_v18 }
  0x76   : > { %704 = vmatprep.subr.bf16.mxu0 %v956_v0 }
  0x79   : > { %705 = vmatpush3.bf16.msra.mxu0 %v799_v31 }
  0x7a   : > { %706 = vmatprep.subr.bf16.mxu0 %v956_v0 }
  0x7d   : > { %707 = vmatpush3.bf16.msra.mxu0 %v800_v32 }
 0x11f   : > { %v275_v24 = vpop.f32.mrf.mxu0 }
 0x120   : > { %v276_v25 = vadd.f32 %v275_v24, %v224_v23 }
 0x121   : > { %v670_v26 = vpop.f32.mrf.mxu0 }
 0x122   : > { %v281_v27 = vmax.f32 %v276_v25, 0.0 }
 0x123   : > { %v278_v28 = vpop.f32.mrf.mxu0 }
 0x124   : > { %v282_v29 = vpack.c.bf16 %v281_v27, %v281_v27 }
 0x125   : > { %v671_v30 = vpop.f32.mrf.mxu0 }
 0x126   : > { %689 = vmatmul.mubr.bf16.vlgmr.msra.gmra.mxu1 %v282_v29 }
 0x1e6   : > { %v386_v35 = vpop.f32.mrf.mxu1 }
 0x1e7   : > { %v387_v36 = vadd.f32 %v386_v35, %v303_v34 }
 0x1e8   : > { %v690_v37 = vpop.f32.mrf.mxu1 }
 0x1e9   : > { %v392_v38 = vmax.f32 %v387_v36, 0.0 }
 0x1ea   : > { %v389_v39 = vpop.f32.mrf.mxu1 }
 0x1eb   : > { %v393_v40 = vpack.c.bf16 %v392_v38, %v392_v38 }
 0x1ec   : > { %v691_v41 = vpop.f32.mrf.mxu1 }
 0x1ed   : > { %709 = vmatmul.mubr.bf16.vlgmr.msra.gmra.mxu0 %v393_v40 }
 0x2ad   : > { %v497_v44 = vpop.f32.mrf.mxu0 }
 0x2ae   : > { %v498_v45 = vadd.f32 %v497_v44, %v414_v43 }
 0x2af   : > { %v710_v46 = vpop.f32.mrf.mxu0 }
 0x2b0   : > { %v503_v47 = vpack.c.bf16 %v498_v45, %v498_v45 }
 0x2b1   : > { %v500_v48 = vpop.f32.mrf.mxu0 }
 0x2b2   : > { %504 = vst [vmem:[%s212_s25] sm:$0xf] %v503_v47 }
 0x2b3   : > { %v711_v49 = vpop.f32.mrf.mxu0 }
 0x2b4   : > { %894 = shalt.err (!%p891_p9)
}
 0x2b5   : > { %s895_s17 = scalar_lea.hbm %s1138_s5, 64  ;;  %s899_s24 = scalar_lea.hbm %s1184_s3, 128 }
 0x2b6   : > { %p896_p13 = scmp.ne.s32.totalorder %s1138_s5, %s895_s17  ;;  %p900_p0 = scmp.lt.s32.totalorder %s1138_s5, %s1184_s3 }
 0x2b7   : > { %p901_p4 = scmp.lt.s32.totalorder %s899_s24, %s895_s17 }
 0x2b8   : > { %p897_p5 = pnand %p896_p13, %p1200_p11 }
 0x2b9   : > { %p902_p8 = por %p901_p4, %p900_p0 }
 0x2ba   : > { %p898_p10 = pneg %p897_p5 }
 0x2bc   : > { %p903_p3 = pnand %p902_p8, %p898_p10 }
 0x2be   : > { %906 = shalt.err (!%p903_p3)
}
 0x2bf   : > { %722 = dma.vmem_to_hbm [thread:$0]  (%p1200_p11), %s1140_s27, 64, %s1138_s5, %s506_s6  }
 0x2c0 PF: > { %s531_s4 = sand.u32 1, %s937_s12   ;;  %p1201_p1 = scmp.ne.s32.totalorder %s1190_s19, 0 }
 0x2c1   : > { %p1202_p2 = scmp.ge.s32.totalorder %s949_s15, 2  ;;  %s532_s18 = scalar_lea.sflag [#allocation4], %s531_s4 }
 0x2c3   : > { %p736_p6 = pnand %p1202_p2, %p1201_p1 }
 0x2c5   : > { %p737_p12 = pneg %p736_p6 }
 0x2c7   : > { %932 = dma.done.wait (%p737_p12), %s532_s18, 64  }
 0x2c8   : > { %934 = vsyncadd (%p737_p12), %s532_s18, 4294967232  ;;  %p17_p7 = scmp.ge.s32.totalorder %s1051_s7, 4   ;;  %s1203_s12 = smov %s941_s13 }
 0x2c9   : > { %s1204_s13 = smov %s945_s14  ;;  %s1205_s14 = smov %s1067_s11 }
 0x2ca   : > { %s1206_s15 = smov %s1051_s7  ;;  %19 = sbr.rel (!%p17_p7) target bundleno = 6 (0x6), region = 87 }
 0x2cf   :  { %537 = vsyncpa [#allocation3], 1 }
 0x2d0   :  { %539 = vsyncpa [#allocation3 + $0x1], 1 }
 0x2d1   :  { %540 = vsyncpa [#allocation6], 1 }
 0x2d2   :  { %541 = vsyncpa [#allocation4], 1 }
 0x2d3   :  { %543 = vsyncpa [#allocation4 + $0x1], 1 }

</bundles_post_ra>
